<compile_context>
chip_gen: v7x
topology: tpu7x:2x2x1
jax: 0.10.0
libtpu: 0.0.40
codegen_flags: <defaults>
</compile_context>

<pallas_src>
import jax
import jax.numpy as jnp
from jax.experimental import pallas as pl
from jax.experimental.pallas import tpu as pltpu


def _round_up(x, m):
    return (x + m - 1) // m * m


# --------------------------------------------------------------------------- #
# Kernel
# --------------------------------------------------------------------------- #
def mlp_kernel(x_ref, w1_ref, b1_ref, w2_ref, b2_ref, o_ref, acc_ref):
    """One (batch-tile, hidden-dim-tile) grid step.

    logits[i] = sum_k relu(x[i] @ W1t[:, k*tdh:(k+1)*tdh] + b1[k]) @ W2t[k]
    The hidden-dim axis is the innermost 'arbitrary' reduction axis; the f32
    logits accumulator lives in VMEM scratch; softmax runs on the last k step.
    """
    k = pl.program_id(1)

    @pl.when(k == 0)
    def _init():
        acc_ref[...] = jnp.zeros_like(acc_ref)

    # f32 -> bf16 cast happens on the VPU inside the kernel (hides under MXU);
    # the wrapper never materializes a casted copy of x in HBM.
    x = x_ref[...].astype(w1_ref.dtype)
    h = jnp.dot(x, w1_ref[...], preferred_element_type=jnp.float32)
    # Dropout is eval-mode identity.
    # TODO(synk): training-mode dropout would use pltpu.prng_seed/prng_random_bits.
    h = jnp.maximum(h + b1_ref[...], 0.0)
    acc_ref[...] += jnp.dot(h.astype(w2_ref.dtype), w2_ref[...],
                            preferred_element_type=jnp.float32)

    @pl.when(k == pl.num_programs(1) - 1)
    def _epilogue():
        # b2 MUST stay f32: padded output columns carry a -1e30 bias (their
        # weight columns are zero) so softmax ignores them without NaN risk.
        logits = acc_ref[...] + b2_ref[...]
        m = jnp.max(logits, axis=1, keepdims=True)
        e = jnp.exp(logits - m)
        denom = jnp.sum(e, axis=1, keepdims=True)
        o_ref[...] = (e / denom).astype(o_ref.dtype)   # exact normalization


# --------------------------------------------------------------------------- #
# One-time parameter prep (transpose + pad + cast) — not per-forward work.
# --------------------------------------------------------------------------- #
def prepare_mlp_params(w1, b1, w2, b2):
    """PyTorch nn.Linear layout (out, in) -> padded, transposed (in_p, out_p)
    bf16 weights and padded f32 biases."""
    dim_hidden, dim_in = w1.shape
    dim_out = w2.shape[0]
    din_p = _round_up(dim_in, 128)
    dh_p = _round_up(dim_hidden, 128)
    dout_p = _round_up(dim_out, 128)

    w1t = jnp.zeros((din_p, dh_p), jnp.float32).at[:dim_in, :dim_hidden].set(w1.T)
    w2t = jnp.zeros((dh_p, dout_p), jnp.float32).at[:dim_hidden, :dim_out].set(w2.T)
    b1p = jnp.zeros((1, dh_p), jnp.float32).at[0, :dim_hidden].set(b1)
    # Padded output columns get a huge negative f32 bias so softmax ignores
    # them (their w2 columns are exactly zero).  Do NOT cast b2 to bf16.
    b2p = jnp.full((1, dout_p), -1e30, jnp.float32).at[0, :dim_out].set(b2)
    assert b2p.dtype == jnp.float32

    return dict(
        w1t=w1t.astype(jnp.bfloat16), b1=b1p,
        w2t=w2t.astype(jnp.bfloat16), b2=b2p,
        dim_in=dim_in, dim_out=dim_out,
        din_p=din_p, dh_p=dh_p, dout_p=dout_p,
    )


# --------------------------------------------------------------------------- #
# VMEM budgeting (generation-aware) and tile selection
# --------------------------------------------------------------------------- #
def _vmem_cap_bytes():
    """~70% of physical VMEM on 64 MiB parts (v7x), ~75% (=96 MiB) on
    128 MiB parts (v5e/v6e)."""
    try:
        cap = int(pltpu.get_tpu_info().vmem_capacity_bytes)
    except Exception:
        cap = 64 << 20          # conservative fallback: v7x-sized VMEM
    frac = 0.70 if cap <= (64 << 20) else 0.75
    return int(cap * frac)


def _footprint_bytes(tb, tdh, din_p, dout_p, w_bufs):
    """x/out tiles double-buffered, weight tiles w_bufs-buffered, plus the f32
    logits accumulator and headroom for Mosaic scratch."""
    f32, bf16 = 4, 2
    x_t = 2 * tb * din_p * f32
    w1_t = w_bufs * din_p * tdh * bf16
    b1_t = w_bufs * tdh * f32
    w2_t = w_bufs * tdh * dout_p * bf16
    b2_t = dout_p * f32
    out_t = 2 * tb * dout_p * f32
    acc_t = tb * dout_p * f32
    return x_t + w1_t + b1_t + w2_t + b2_t + out_t + acc_t + (4 << 20)


def _pick_tiles(B, din_p, dh_p, dout_p, cap):
    # Batch tile: as big as useful (HBM roofline), but keep >=2 grid steps
    # when the batch allows so the 'parallel' batch axis can shard across
    # v7x's two TensorCores.
    b_pad = _round_up(B, 8)                         # f32 sublane packing
    tb = min(512, b_pad)
    if b_pad // tb < 2 and b_pad >= 16:
        tb = _round_up(-(-b_pad // 2), 8)

    nblk = dh_p // 128

    def pick_tdh(tb_):
        # Largest divisor-of-dh_p tile (multiple of 128) whose footprint fits.
        for g in range(nblk, 0, -1):
            if nblk % g == 0:
                tdh_ = g * 128
                n_dh_ = nblk // g
                if _footprint_bytes(tb_, tdh_, din_p, dout_p,
                                    1 if n_dh_ == 1 else 2) <= cap:
                    return tdh_
        return 128

    tdh = pick_tdh(tb)
    while (_footprint_bytes(tb, tdh, din_p, dout_p,
                            1 if dh_p // tdh == 1 else 2) > cap and tb > 8):
        tb = max(8, _round_up(tb // 2, 8))
        tdh = pick_tdh(tb)

    b_pad = _round_up(b_pad, tb)
    return tb, tdh, b_pad


# --------------------------------------------------------------------------- #
# Forward
# --------------------------------------------------------------------------- #
def mlp_forward(x, params, out_dtype=jnp.float32):
    """x: (B, C, H, W) float32.  params: output of prepare_mlp_params.
    out_dtype=jnp.bfloat16 halves output writeback if downstream tolerates it;
    default f32 matches the PyTorch module."""
    B = x.shape[0]
    dim_in, dim_out = params["dim_in"], params["dim_out"]
    din_p, dh_p, dout_p = params["din_p"], params["dh_p"], params["dout_p"]

    x2d = x.reshape(B, -1)
    assert x2d.shape[1] == dim_in

    cap = _vmem_cap_bytes()
    tb, tdh, b_pad = _pick_tiles(B, din_p, dh_p, dout_p, cap)
    n_b, n_dh = b_pad // tb, dh_p // tdh

    # Feed x in its native dtype (no wrapper cast pass); pad only if needed.
    if (b_pad, din_p) != x2d.shape:
        x_in = jnp.zeros((b_pad, din_p), x2d.dtype).at[:B, :dim_in].set(x2d)
    else:
        x_in = x2d

    w_bufs = 1 if n_dh == 1 else 2   # resident weights: single-buffered

    # Request covers the (rare) no-hints fallback where weights stay 2-buffered.
    vmem_req = int(min(cap, max(32 << 20,
                                _footprint_bytes(tb, tdh, din_p, dout_p, 2))))

    def run(with_hints):
        def bs(shape, index_map, bufs=None):
            if with_hints and bufs is not None:
                return pl.BlockSpec(shape, index_map,
                                    pipeline_mode=pl.Buffered(bufs))
            return pl.BlockSpec(shape, index_map)

        in_specs = [
            bs((tb, din_p),   lambda i, k: (i, 0)),            # x: batch-tiled
            bs((din_p, tdh),  lambda i, k: (0, k), w_bufs),    # W1^T: dh-tiled
            bs((1, tdh),      lambda i, k: (0, k), w_bufs),    # b1
            bs((tdh, dout_p), lambda i, k: (k, 0), w_bufs),    # W2^T: dh-tiled
            bs((1, dout_p),   lambda i, k: (0, 0), 1),         # b2: resident
        ]
        out_spec = bs((tb, dout_p), lambda i, k: (i, 0))

        return pl.pallas_call(
            mlp_kernel,
            out_shape=jax.ShapeDtypeStruct((b_pad, dout_p), out_dtype),
            grid=(n_b, n_dh),
            in_specs=in_specs,
            out_specs=out_spec,
            scratch_shapes=[pltpu.VMEM((tb, dout_p), jnp.float32)],
            compiler_params=pltpu.CompilerParams(
                dimension_semantics=("parallel", "arbitrary"),
                vmem_limit_bytes=vmem_req,
            ),
        )(x_in, params["w1t"], params["b1"], params["w2t"], params["b2"])

    try:
        out = run(with_hints=True)
    except Exception:
        # Fallback for JAX builds without BlockSpec pipeline_mode support.
        out = run(with_hints=False)

    return out[:B, :dim_out]


# --------------------------------------------------------------------------- #
# Demo / correctness check
# --------------------------------------------------------------------------- #
def init_linear_params(key, fan_in, fan_out):
    """Deterministic init mimicking nn.Linear's uniform ranges (PyTorch layout)."""
    kw, kb = jax.random.split(key)
    bound = 1.0 / jnp.sqrt(float(fan_in))
    w = jax.random.uniform(kw, (fan_out, fan_in), jnp.float32, -bound, bound)
    b = jax.random.uniform(kb, (fan_out,), jnp.float32, -bound, bound)
    return w, b


if __name__ == "__main__":
    # Small shapes consistent with the module: x is NCHW, flattened to dim_in.
    B, C, H, W = 2, 4, 16, 16
    dim_in = C * H * W          # 1024
    dim_hidden = 32
    dim_out = 10

    key = jax.random.PRNGKey(0)
    kx, k1, k2 = jax.random.split(key, 3)

    x = jax.random.normal(kx, (B, C, H, W), jnp.float32)
    w1, b1 = init_linear_params(k1, dim_in, dim_hidden)
    w2, b2 = init_linear_params(k2, dim_hidden, dim_out)

    params = prepare_mlp_params(w1, b1, w2, b2)   # one-time transpose/pad/cast
    out = mlp_forward(x, params)
    out = jax.block_until_ready(out)

    # Reference with matching bf16-operand / f32-accumulation numerics
    # (eval-mode dropout = identity).
    x2d = x.reshape(B, dim_in)
    h_ref = jnp.maximum(
        jnp.dot(x2d.astype(jnp.bfloat16), w1.T.astype(jnp.bfloat16),
                preferred_element_type=jnp.float32) + b1, 0.0)
    logits_ref = jnp.dot(h_ref.astype(jnp.bfloat16), w2.T.astype(jnp.bfloat16),
                         preferred_element_type=jnp.float32) + b2
    ref = jax.nn.softmax(logits_ref, axis=1)

    assert out.shape == (B, dim_out)
    assert jnp.allclose(out, ref, atol=5e-3, rtol=5e-3), float(jnp.max(jnp.abs(out - ref)))
    assert jnp.allclose(jnp.sum(out, axis=1), 1.0, atol=5e-3)

    print("KERNEL_OK")
</pallas_src>

<mosaic_0001>
module attributes {stable_mosaic.version = 11 : i64} {
  func.func @mlp_kernel(%arg0: i32, %arg1: i32, %arg2: memref<8x1024xf32, #tpu.memory_space<vmem>>, %arg3: memref<1024x128xbf16, #tpu.memory_space<vmem>>, %arg4: memref<1x128xf32, #tpu.memory_space<vmem>>, %arg5: memref<128x128xbf16, #tpu.memory_space<vmem>>, %arg6: memref<1x128xf32, #tpu.memory_space<vmem>>, %arg7: memref<8x128xf32, #tpu.memory_space<vmem>>, %arg8: memref<8x128xf32, #tpu.memory_space<vmem>>) attributes {dimension_semantics = [#tpu.dimension_semantics<parallel>, #tpu.dimension_semantics<arbitrary>], iteration_bounds = array<i64: 1, 1>, scalar_prefetch = 0 : i64, scratch_operands = 1 : i64, tpu.core_type = #tpu.core_type<tc>, window_params = [{transform_indices = @transform_0, window_bounds = array<i64: 8, 1024>}, {pipeline_mode = #tpu.pipeline_mode<synchronous>, transform_indices = @transform_1, window_bounds = array<i64: 1024, 128>}, {pipeline_mode = #tpu.pipeline_mode<synchronous>, transform_indices = @transform_2, window_bounds = array<i64: 1, 128>}, {pipeline_mode = #tpu.pipeline_mode<synchronous>, transform_indices = @transform_3, window_bounds = array<i64: 128, 128>}, {pipeline_mode = #tpu.pipeline_mode<synchronous>, transform_indices = @transform_4, window_bounds = array<i64: 1, 128>}, {transform_indices = @transform_5, window_bounds = array<i64: 8, 128>}]} {
    %c0_i32 = arith.constant 0 : i32
    %0 = arith.cmpi eq, %arg1, %c0_i32 : i32
    %1 = arith.extui %0 : i1 to i32
    %c0_i32_0 = arith.constant 0 : i32
    %2 = arith.cmpi ne, %1, %c0_i32_0 : i32
    scf.if %2 {
      %cst_16 = arith.constant 0.000000e+00 : f32
      %21 = vector.broadcast %cst_16 : f32 to vector<8x128xf32>
      %c0_17 = arith.constant 0 : index
      %c0_18 = arith.constant 0 : index
      %22 = vector.load %arg8[%c0_17, %c0_18] : memref<8x128xf32, #tpu.memory_space<vmem>>, vector<8x128xf32>
      tpu.vector_store %arg8[%c0_17, %c0_18], %21 {strides = array<i32>} : memref<8x128xf32, #tpu.memory_space<vmem>>, vector<8x128xf32>,
    } else {
    }
    %c0 = arith.constant 0 : index
    %c0_1 = arith.constant 0 : index
    %3 = vector.load %arg2[%c0, %c0_1] : memref<8x1024xf32, #tpu.memory_space<vmem>>, vector<8x1024xf32>
    %4 = arith.truncf %3 : vector<8x1024xf32> to vector<8x1024xbf16>
    %c0_2 = arith.constant 0 : index
    %c0_3 = arith.constant 0 : index
    %5 = vector.load %arg3[%c0_2, %c0_3] : memref<1024x128xbf16, #tpu.memory_space<vmem>>, vector<1024x128xbf16>
    %cst = arith.constant dense<0.000000e+00> : vector<8x128xf32>
    %6 = tpu.matmul %4, %5, %cst {dimension_numbers = #tpu.dot_dimension_numbers<[1], [0], [0], [1], [0, 0, 1, 1], [], []>} : vector<8x1024xbf16>, vector<1024x128xbf16>, vector<8x128xf32> -> vector<8x128xf32>
    %c0_4 = arith.constant 0 : index
    %c0_5 = arith.constant 0 : index
    %7 = vector.load %arg4[%c0_4, %c0_5] : memref<1x128xf32, #tpu.memory_space<vmem>>, vector<1x128xf32>
    %8 = vector.broadcast %7 : vector<1x128xf32> to vector<8x128xf32>
    %9 = arith.addf %6, %8 : vector<8x128xf32>
    %cst_6 = arith.constant 0.000000e+00 : f32
    %10 = vector.broadcast %cst_6 : f32 to vector<8x128xf32>
    %11 = arith.maximumf %9, %10 : vector<8x128xf32>
    %c0_7 = arith.constant 0 : index
    %c0_8 = arith.constant 0 : index
    %12 = vector.load %arg8[%c0_7, %c0_8] : memref<8x128xf32, #tpu.memory_space<vmem>>, vector<8x128xf32>
    %13 = arith.truncf %11 : vector<8x128xf32> to vector<8x128xbf16>
    %c0_9 = arith.constant 0 : index
    %c0_10 = arith.constant 0 : index
    %14 = vector.load %arg5[%c0_9, %c0_10] : memref<128x128xbf16, #tpu.memory_space<vmem>>, vector<128x128xbf16>
    %cst_11 = arith.constant dense<0.000000e+00> : vector<8x128xf32>
    %15 = tpu.matmul %13, %14, %cst_11 {dimension_numbers = #tpu.dot_dimension_numbers<[1], [0], [0], [1], [0, 0, 1, 1], [], []>} : vector<8x128xbf16>, vector<128x128xbf16>, vector<8x128xf32> -> vector<8x128xf32>
    %16 = arith.addf %12, %15 : vector<8x128xf32>
    %c0_12 = arith.constant 0 : index
    %c0_13 = arith.constant 0 : index
    %17 = vector.load %arg8[%c0_12, %c0_13] : memref<8x128xf32, #tpu.memory_space<vmem>>, vector<8x128xf32>
    tpu.vector_store %arg8[%c0_12, %c0_13], %16 {strides = array<i32>} : memref<8x128xf32, #tpu.memory_space<vmem>>, vector<8x128xf32>,
    %c0_i32_14 = arith.constant 0 : i32
    %18 = arith.cmpi eq, %arg1, %c0_i32_14 : i32
    %19 = arith.extui %18 : i1 to i32
    %c0_i32_15 = arith.constant 0 : i32
    %20 = arith.cmpi ne, %19, %c0_i32_15 : i32
    scf.if %20 {
      %c0_16 = arith.constant 0 : index
      %c0_17 = arith.constant 0 : index
      %21 = vector.load %arg8[%c0_16, %c0_17] : memref<8x128xf32, #tpu.memory_space<vmem>>, vector<8x128xf32>
      %c0_18 = arith.constant 0 : index
      %c0_19 = arith.constant 0 : index
      %22 = vector.load %arg6[%c0_18, %c0_19] : memref<1x128xf32, #tpu.memory_space<vmem>>, vector<1x128xf32>
      %23 = vector.broadcast %22 : vector<1x128xf32> to vector<8x128xf32>
      %24 = arith.addf %21, %23 : vector<8x128xf32>
      %cst_20 = arith.constant dense<0xFF800000> : vector<8xf32>
      %25 = vector.multi_reduction <maximumf>, %24, %cst_20 [1] : vector<8x128xf32> to vector<8xf32>
      %26 = vector.shape_cast %25 : vector<8xf32> to vector<8x1xf32>
      %27 = vector.broadcast %26 : vector<8x1xf32> to vector<8x128xf32>
      %28 = arith.subf %24, %27 : vector<8x128xf32>
      %29 = math.exp %28 : vector<8x128xf32>
      %cst_21 = arith.constant dense<0.000000e+00> : vector<8xf32>
      %30 = vector.multi_reduction <add>, %29, %cst_21 [1] : vector<8x128xf32> to vector<8xf32>
      %31 = vector.shape_cast %30 : vector<8xf32> to vector<8x1xf32>
      %32 = vector.broadcast %31 : vector<8x1xf32> to vector<8x128xf32>
      %33 = arith.divf %29, %32 : vector<8x128xf32>
      %c0_22 = arith.constant 0 : index
      %c0_23 = arith.constant 0 : index
      %34 = vector.load %arg7[%c0_22, %c0_23] : memref<8x128xf32, #tpu.memory_space<vmem>>, vector<8x128xf32>
      tpu.vector_store %arg7[%c0_22, %c0_23], %33 {strides = array<i32>} : memref<8x128xf32, #tpu.memory_space<vmem>>, vector<8x128xf32>,
    } else {
    }
    return
  }
  func.func @transform_0(%arg0: i32, %arg1: i32) -> (i32, i32) {
    %c0_i32 = arith.constant 0 : i32
    %c0_i32_0 = arith.constant 0 : i32
    return %arg0, %c0_i32 : i32, i32
  }
  func.func @transform_1(%arg0: i32, %arg1: i32) -> (i32, i32) {
    %c0_i32 = arith.constant 0 : i32
    %c0_i32_0 = arith.constant 0 : i32
    return %c0_i32, %arg1 : i32, i32
  }
  func.func @transform_2(%arg0: i32, %arg1: i32) -> (i32, i32) {
    %c0_i32 = arith.constant 0 : i32
    %c0_i32_0 = arith.constant 0 : i32
    return %c0_i32, %arg1 : i32, i32
  }
  func.func @transform_3(%arg0: i32, %arg1: i32) -> (i32, i32) {
    %c0_i32 = arith.constant 0 : i32
    %c0_i32_0 = arith.constant 0 : i32
    return %arg1, %c0_i32 : i32, i32
  }
  func.func @transform_4(%arg0: i32, %arg1: i32) -> (i32, i32) {
    %c0_i32 = arith.constant 0 : i32
    %c0_i32_0 = arith.constant 0 : i32
    %c0_i32_1 = arith.constant 0 : i32
    return %c0_i32, %c0_i32_0 : i32, i32
  }
  func.func @transform_5(%arg0: i32, %arg1: i32) -> (i32, i32) {
    %c0_i32 = arith.constant 0 : i32
    %c0_i32_0 = arith.constant 0 : i32
    return %arg0, %c0_i32 : i32, i32
  }
}

module attributes {stable_mosaic.version = 11 : i64} {
  func.func @mlp_kernel(%arg0: i32, %arg1: i32, %arg2: memref<8x1024xf32, #tpu.memory_space<vmem>>, %arg3: memref<1024x128xbf16, #tpu.memory_space<vmem>>, %arg4: memref<1x128xf32, #tpu.memory_space<vmem>>, %arg5: memref<128x128xbf16, #tpu.memory_space<vmem>>, %arg6: memref<1x128xf32, #tpu.memory_space<vmem>>, %arg7: memref<8x128xf32, #tpu.memory_space<vmem>>, %arg8: memref<8x128xf32, #tpu.memory_space<vmem>>) attributes {dimension_semantics = [#tpu.dimension_semantics<parallel>, #tpu.dimension_semantics<arbitrary>], iteration_bounds = array<i64: 1, 1>, scalar_prefetch = 0 : i64, scratch_operands = 1 : i64, tpu.core_type = #tpu.core_type<tc>, window_params = [{transform_indices = @transform_0, window_bounds = array<i64: 8, 1024>}, {transform_indices = @transform_1, window_bounds = array<i64: 1024, 128>}, {transform_indices = @transform_2, window_bounds = array<i64: 1, 128>}, {transform_indices = @transform_3, window_bounds = array<i64: 128, 128>}, {pipeline_mode = #tpu.pipeline_mode<synchronous>, transform_indices = @transform_4, window_bounds = array<i64: 1, 128>}, {transform_indices = @transform_5, window_bounds = array<i64: 8, 128>}]} {
    %c0_i32 = arith.constant 0 : i32
    %0 = arith.cmpi eq, %arg1, %c0_i32 : i32
    %1 = arith.extui %0 : i1 to i32
    %c0_i32_0 = arith.constant 0 : i32
    %2 = arith.cmpi ne, %1, %c0_i32_0 : i32
    scf.if %2 {
      %cst_16 = arith.constant 0.000000e+00 : f32
      %21 = vector.broadcast %cst_16 : f32 to vector<8x128xf32>
      %c0_17 = arith.constant 0 : index
      %c0_18 = arith.constant 0 : index
      %22 = vector.load %arg8[%c0_17, %c0_18] : memref<8x128xf32, #tpu.memory_space<vmem>>, vector<8x128xf32>
      tpu.vector_store %arg8[%c0_17, %c0_18], %21 {strides = array<i32>} : memref<8x128xf32, #tpu.memory_space<vmem>>, vector<8x128xf32>,
    } else {
    }
    %c0 = arith.constant 0 : index
    %c0_1 = arith.constant 0 : index
    %3 = vector.load %arg2[%c0, %c0_1] : memref<8x1024xf32, #tpu.memory_space<vmem>>, vector<8x1024xf32>
    %4 = arith.truncf %3 : vector<8x1024xf32> to vector<8x1024xbf16>
    %c0_2 = arith.constant 0 : index
    %c0_3 = arith.constant 0 : index
    %5 = vector.load %arg3[%c0_2, %c0_3] : memref<1024x128xbf16, #tpu.memory_space<vmem>>, vector<1024x128xbf16>
    %cst = arith.constant dense<0.000000e+00> : vector<8x128xf32>
    %6 = tpu.matmul %4, %5, %cst {dimension_numbers = #tpu.dot_dimension_numbers<[1], [0], [0], [1], [0, 0, 1, 1], [], []>} : vector<8x1024xbf16>, vector<1024x128xbf16>, vector<8x128xf32> -> vector<8x128xf32>
    %c0_4 = arith.constant 0 : index
    %c0_5 = arith.constant 0 : index
    %7 = vector.load %arg4[%c0_4, %c0_5] : memref<1x128xf32, #tpu.memory_space<vmem>>, vector<1x128xf32>
    %8 = vector.broadcast %7 : vector<1x128xf32> to vector<8x128xf32>
    %9 = arith.addf %6, %8 : vector<8x128xf32>
    %cst_6 = arith.constant 0.000000e+00 : f32
    %10 = vector.broadcast %cst_6 : f32 to vector<8x128xf32>
    %11 = arith.maximumf %9, %10 : vector<8x128xf32>
    %c0_7 = arith.constant 0 : index
    %c0_8 = arith.constant 0 : index
    %12 = vector.load %arg8[%c0_7, %c0_8] : memref<8x128xf32, #tpu.memory_space<vmem>>, vector<8x128xf32>
    %13 = arith.truncf %11 : vector<8x128xf32> to vector<8x128xbf16>
    %c0_9 = arith.constant 0 : index
    %c0_10 = arith.constant 0 : index
    %14 = vector.load %arg5[%c0_9, %c0_10] : memref<128x128xbf16, #tpu.memory_space<vmem>>, vector<128x128xbf16>
    %cst_11 = arith.constant dense<0.000000e+00> : vector<8x128xf32>
    %15 = tpu.matmul %13, %14, %cst_11 {dimension_numbers = #tpu.dot_dimension_numbers<[1], [0], [0], [1], [0, 0, 1, 1], [], []>} : vector<8x128xbf16>, vector<128x128xbf16>, vector<8x128xf32> -> vector<8x128xf32>
    %16 = arith.addf %12, %15 : vector<8x128xf32>
    %c0_12 = arith.constant 0 : index
    %c0_13 = arith.constant 0 : index
    %17 = vector.load %arg8[%c0_12, %c0_13] : memref<8x128xf32, #tpu.memory_space<vmem>>, vector<8x128xf32>
    tpu.vector_store %arg8[%c0_12, %c0_13], %16 {strides = array<i32>} : memref<8x128xf32, #tpu.memory_space<vmem>>, vector<8x128xf32>,
    %c0_i32_14 = arith.constant 0 : i32
    %18 = arith.cmpi eq, %arg1, %c0_i32_14 : i32
    %19 = arith.extui %18 : i1 to i32
    %c0_i32_15 = arith.constant 0 : i32
    %20 = arith.cmpi ne, %19, %c0_i32_15 : i32
    scf.if %20 {
      %c0_16 = arith.constant 0 : index
      %c0_17 = arith.constant 0 : index
      %21 = vector.load %arg8[%c0_16, %c0_17] : memref<8x128xf32, #tpu.memory_space<vmem>>, vector<8x128xf32>
      %c0_18 = arith.constant 0 : index
      %c0_19 = arith.constant 0 : index
      %22 = vector.load %arg6[%c0_18, %c0_19] : memref<1x128xf32, #tpu.memory_space<vmem>>, vector<1x128xf32>
      %23 = vector.broadcast %22 : vector<1x128xf32> to vector<8x128xf32>
      %24 = arith.addf %21, %23 : vector<8x128xf32>
      %cst_20 = arith.constant dense<0xFF800000> : vector<8xf32>
      %25 = vector.multi_reduction <maximumf>, %24, %cst_20 [1] : vector<8x128xf32> to vector<8xf32>
      %26 = vector.shape_cast %25 : vector<8xf32> to vector<8x1xf32>
      %27 = vector.broadcast %26 : vector<8x1xf32> to vector<8x128xf32>
      %28 = arith.subf %24, %27 : vector<8x128xf32>
      %29 = math.exp %28 : vector<8x128xf32>
      %cst_21 = arith.constant dense<0.000000e+00> : vector<8xf32>
      %30 = vector.multi_reduction <add>, %29, %cst_21 [1] : vector<8x128xf32> to vector<8xf32>
      %31 = vector.shape_cast %30 : vector<8xf32> to vector<8x1xf32>
      %32 = vector.broadcast %31 : vector<8x1xf32> to vector<8x128xf32>
      %33 = arith.divf %29, %32 : vector<8x128xf32>
      %c0_22 = arith.constant 0 : index
      %c0_23 = arith.constant 0 : index
      %34 = vector.load %arg7[%c0_22, %c0_23] : memref<8x128xf32, #tpu.memory_space<vmem>>, vector<8x128xf32>
      tpu.vector_store %arg7[%c0_22, %c0_23], %33 {strides = array<i32>} : memref<8x128xf32, #tpu.memory_space<vmem>>, vector<8x128xf32>,
    } else {
    }
    return
  }
  func.func @transform_0(%arg0: i32, %arg1: i32) -> (i32, i32) {
    %c0_i32 = arith.constant 0 : i32
    %c0_i32_0 = arith.constant 0 : i32
    return %arg0, %c0_i32 : i32, i32
  }
  func.func @transform_1(%arg0: i32, %arg1: i32) -> (i32, i32) {
    %c0_i32 = arith.constant 0 : i32
    %c0_i32_0 = arith.constant 0 : i32
    return %c0_i32, %arg1 : i32, i32
  }
  func.func @transform_2(%arg0: i32, %arg1: i32) -> (i32, i32) {
    %c0_i32 = arith.constant 0 : i32
    %c0_i32_0 = arith.constant 0 : i32
    return %c0_i32, %arg1 : i32, i32
  }
  func.func @transform_3(%arg0: i32, %arg1: i32) -> (i32, i32) {
    %c0_i32 = arith.constant 0 : i32
    %c0_i32_0 = arith.constant 0 : i32
    return %arg1, %c0_i32 : i32, i32
  }
  func.func @transform_4(%arg0: i32, %arg1: i32) -> (i32, i32) {
    %c0_i32 = arith.constant 0 : i32
    %c0_i32_0 = arith.constant 0 : i32
    %c0_i32_1 = arith.constant 0 : i32
    return %c0_i32, %c0_i32_0 : i32, i32
  }
  func.func @transform_5(%arg0: i32, %arg1: i32) -> (i32, i32) {
    %c0_i32 = arith.constant 0 : i32
    %c0_i32_0 = arith.constant 0 : i32
    return %arg0, %c0_i32 : i32, i32
  }
}

</mosaic_0001>

<bundles_post_ra>
// kernel: tpu_custom_call.1
= control target key start
LH: loop header
LB: loop body
LE: loop exit
PB: predicated region body
PF: predicated region fallthrough
CT: control target
= control target key end

     0   :  { %10 = vsyncpa [#allocation4], 0  ;;  %s1375_s0 = inlined_call_operand.hbm [shape: f32[8,1024], index: 0, kind: input, shape index: {}]   ;;  %s1376_s1 = inlined_call_operand.hbm [shape: bf16[1024,128], index: 1, kind: input, shape index: {}]   ;;  %s1377_s2 = inlined_call_operand.vmem [shape: f32[1,128], index: 2, kind: input, shape index: {}]   ;;  %s1378_s3 = inlined_call_operand.hbm [shape: bf16[128,128], index: 3, kind: input, shape index: {}]   ;;  %s1379_s4 = inlined_call_operand.vmem [shape: f32[1,128], index: 4, kind: input, shape index: {}]   ;;  %s1380_s5 = inlined_call_operand.hbm [shape: f32[8,128], index: 5, kind: output, shape index: {}]  }
   0x1   :  { %11 = vsyncpa [#allocation7], 0 }
   0x2   :  { %12 = vsyncpa [#allocation5], 0  ;;  %s1277_s18 = smov [#allocation6]   ;;  %s1183_s22 = scalar_lea.hbm %s1376_s1, 8192 }
   0x3   :  { %s28_s19 = sshll.u32 %s1277_s18, 4  ;;  %p1184_p0 = scmp.ne.s32.totalorder %s1376_s1, %s1183_s22  ;;  %s29_s19 = int_to_ptr.vmem [resolvable:$true] %s28_s19 }
   0x4   :  { %p1187_p1 = scmp.lt.u32.totalorder %s1183_s22, %s1376_s1 }
   0x6   :  { %p1189_p2 = pnand %p1187_p1, %p1184_p0 }
   0x8   :  { %1192 = shalt.err (!%p1189_p2)
}
   0x9   :  { %s1193_s27 = scalar_lea.vmem %s29_s19, 8192  ;;  %p1198_p4 = scmp.lt.s32.totalorder %s29_s19, %s29_s19 }
   0xa   :  { %p1194_p3 = scmp.ne.s32.totalorder %s29_s19, %s1193_s27  ;;  %p1199_p5 = scmp.lt.s32.totalorder %s1193_s27, %s1193_s27 }
   0xc   :  { %p1200_p6 = por %p1199_p5, %p1198_p4 }
   0xe   :  { %p1201_p7 = pnand %p1200_p6, %p1194_p3 }
  0x10   :  { %1204 = shalt.err (!%p1201_p7)
}
  0x11   :  { %s1278_s28 = smov 64   ;;  %s1279_s29 = smov 4  }
  0x12   :  { %34 = dma.hbm_to_vmem [thread:$0]  %s1376_s1, 8192, %s29_s19, [#allocation7], %s1278_s28, %s1278_s28, %s1279_s29  }
  0x13   :  { %s1280_s7 = smov [#allocation3]   ;;  %s1281_s9 = smov [#allocation8]  }
  0x14   :  { %s19_s8 = sshll.u32 %s1280_s7, 4  ;;  %s42_s10 = sshll.u32 %s1281_s9, 4  ;;  %s20_s8 = int_to_ptr.vmem [resolvable:$true] %s19_s8  ;;  %s43_s10 = int_to_ptr.vmem [resolvable:$true] %s42_s10 }
  0x15   :  { %s1205_s13 = scalar_lea.hbm %s1375_s0, 1024 }
  0x16   :  { %p1206_p8 = scmp.ne.s32.totalorder %s1375_s0, %s1205_s13  ;;  %p1209_p9 = scmp.lt.u32.totalorder %s1205_s13, %s1375_s0 }
  0x18   :  { %p1211_p10 = pnand %p1209_p9, %p1206_p8 }
  0x1a   :  { %1214 = shalt.err (!%p1211_p10)
}
  0x1b   :  { %s1215_s1 = scalar_lea.vmem %s20_s8, 1024  ;;  %p1220_p12 = scmp.lt.s32.totalorder %s20_s8, %s20_s8 }
  0x1c   :  { %p1216_p11 = scmp.ne.s32.totalorder %s20_s8, %s1215_s1  ;;  %p1221_p13 = scmp.lt.s32.totalorder %s1215_s1, %s1215_s1 }
  0x1e   :  { %p1222_p0 = por %p1221_p13, %p1220_p12 }
  0x20   :  { %p1223_p1 = pnand %p1222_p0, %p1216_p11 }
  0x22   :  { %1226 = shalt.err (!%p1223_p1)
}
  0x23   :  { %22 = dma.hbm_to_vmem [thread:$0]  %s1375_s0, 1024, %s20_s8, [#allocation4]  }
  0x24   :  { %s1227_s22 = scalar_lea.hbm %s1378_s3, 1024 }
  0x25   :  { %p1228_p2 = scmp.ne.s32.totalorder %s1378_s3, %s1227_s22  ;;  %p1231_p3 = scmp.lt.u32.totalorder %s1227_s22, %s1378_s3 }
  0x27   :  { %p1233_p4 = pnand %p1231_p3, %p1228_p2 }
  0x29   :  { %1236 = shalt.err (!%p1233_p4)
}
  0x2a   :  { %s1237_s27 = scalar_lea.vmem %s43_s10, 1024  ;;  %p1242_p6 = scmp.lt.s32.totalorder %s43_s10, %s43_s10 }
  0x2b   :  { %p1238_p5 = scmp.ne.s32.totalorder %s43_s10, %s1237_s27  ;;  %p1243_p7 = scmp.lt.s32.totalorder %s1237_s27, %s1237_s27 }
  0x2d   :  { %p1244_p8 = por %p1243_p7, %p1242_p6 }
  0x2f   :  { %p1245_p9 = pnand %p1244_p8, %p1238_p5 }
  0x31   :  { %1248 = shalt.err (!%p1245_p9)
}
  0x32   :  { %48 = dma.hbm_to_vmem [thread:$0]  %s1378_s3, 1024, %s43_s10, [#allocation7], %s1278_s28, %s1278_s28, %s1279_s29  }
  0x33   :  { %1271 = dma.done.wait [#allocation4], 1024  }
  0x34   :  { %1272 = vsyncadd [#allocation4], 4294966272 }
  0x35   :  { %1273 = dma.done.wait [#allocation7], 9216  }
  0x36   :  { %1274 = vsyncadd [#allocation7], 4294958080  ;;  %v1107_v0 = vld [vmem:[#allocation6 + $0x40] sm:$0xff]   ;;  %v1111_v4 = vld [vmem:[#allocation6 + $0x48] sm:$0xff]   ;;  %vm1283_vm0 = vmmov 0   ;;  %s1284_s6 = smov [#allocation9]  }
  0x37   :  { %v1108_v1 = vld [vmem:[#allocation6 + $0xc0] sm:$0xff]   ;;  %982 = vmatprep.subr.bf16.mxu0 %v1107_v0  ;;  %v1112_v5 = vld [vmem:[#allocation6 + $0xc8] sm:$0xff]   ;;  %v1115_v8 = vld [vmem:[#allocation6 + $0x50] sm:$0xff]   ;;  %s898_s7 = sshll.u32 %s1284_s6, 4  ;;  %s899_s7 = int_to_ptr.vmem [resolvable:$true] %s898_s7 }
  0x38   :  { %v1109_v2 = vld [vmem:[#allocation6] sm:$0xff]   ;;  %1004 = vmatprep.subr.bf16.mxu1 %v1108_v1  ;;  %v1113_v6 = vld [vmem:[#allocation6 + $0x8] sm:$0xff]   ;;  %v1116_v9 = vld [vmem:[#allocation6 + $0xd0] sm:$0xff]   ;;  %p1254_p11 = scmp.lt.s32.totalorder %s899_s7, %s899_s7 }
  0x39   :  { %v1110_v3 = vld [vmem:[#allocation6 + $0x80] sm:$0xff]   ;;  %983 = vmatpush3.bf16.msra.mxu0 %v1109_v2  ;;  %v1114_v7 = vld [vmem:[#allocation6 + $0x88] sm:$0xff]   ;;  %v1117_v10 = vld [vmem:[#allocation6 + $0x10] sm:$0xff]  }
  0x3a   :  { %1005 = vmatpush3.bf16.msra.mxu1 %v1110_v3  ;;  %984 = vmatprep.subr.bf16.mxu0 %v1111_v4  ;;  %v1118_v11 = vld [vmem:[#allocation6 + $0x90] sm:$0xff]   ;;  %v1119_v12 = vld [vmem:[#allocation6 + $0x58] sm:$0xff]   ;;  %v1123_v16 = vld [vmem:[#allocation6 + $0x60] sm:$0xff]  }
  0x3b   :  { %1006 = vmatprep.subr.bf16.mxu1 %v1112_v5  ;;  %v1120_v13 = vld [vmem:[#allocation6 + $0xd8] sm:$0xff]   ;;  %v1124_v17 = vld [vmem:[#allocation6 + $0xe0] sm:$0xff]   ;;  %v1127_v20 = vld [vmem:[#allocation6 + $0x68] sm:$0xff]  }
  0x3c   :  { %v1121_v14 = vld [vmem:[#allocation6 + $0x18] sm:$0xff]   ;;  %v1125_v18 = vld [vmem:[#allocation6 + $0x20] sm:$0xff]   ;;  %v1128_v21 = vld [vmem:[#allocation6 + $0xe8] sm:$0xff]  }
  0x3d   :  { %985 = vmatpush3.bf16.msra.mxu0 %v1113_v6  ;;  %v1122_v15 = vld [vmem:[#allocation6 + $0x98] sm:$0xff]   ;;  %v1126_v19 = vld [vmem:[#allocation6 + $0xa0] sm:$0xff]   ;;  %v1129_v22 = vld [vmem:[#allocation6 + $0x28] sm:$0xff]  }
  0x3e   :  { %1007 = vmatpush3.bf16.msra.mxu1 %v1114_v7  ;;  %986 = vmatprep.subr.bf16.mxu0 %v1115_v8  ;;  %v1130_v23 = vld [vmem:[#allocation6 + $0xa8] sm:$0xff]   ;;  %v1131_v24 = vld [vmem:[#allocation6 + $0x70] sm:$0xff]   ;;  %v1135_v28 = vld [vmem:[#allocation6 + $0x78] sm:$0xff]  }
  0x3f   :  { %1008 = vmatprep.subr.bf16.mxu1 %v1116_v9  ;;  %v1132_v25 = vld [vmem:[#allocation6 + $0xf0] sm:$0xff]   ;;  %v1136_v29 = vld [vmem:[#allocation6 + $0xf8] sm:$0xff]   ;;  %v67_v32 = vld [vmem:[#allocation3 + $0x8] sm:$0xff] }
  0x40   :  { %v1133_v26 = vld [vmem:[#allocation6 + $0x30] sm:$0xff]   ;;  %v1137_v30 = vld [vmem:[#allocation6 + $0x38] sm:$0xff]   ;;  %v66_v34 = vld [vmem:[#allocation3] sm:$0xff]  ;;  %v75_v35 = vpack.c.bf16 %v67_v32, %v67_v32 }
  0x41   :  { %987 = vmatpush3.bf16.msra.mxu0 %v1117_v10  ;;  %v1134_v27 = vld [vmem:[#allocation6 + $0xb0] sm:$0xff]   ;;  %v1138_v31 = vld [vmem:[#allocation6 + $0xb8] sm:$0xff]   ;;  %v74_v37 = vpack.c.bf16 %v66_v34, %v66_v34  ;;  %v1139_v40 = vld [vmem:[#allocation6 + $0x140] sm:$0xff]  }
  0x42   :  { %1009 = vmatpush3.bf16.msra.mxu1 %v1118_v11  ;;  %988 = vmatprep.subr.bf16.mxu0 %v1119_v12  ;;  %v69_v33 = vld [vmem:[#allocation3 + $0x18] sm:$0xff]  ;;  %v68_v38 = vld [vmem:[#allocation3 + $0x10] sm:$0xff]  ;;  %v1140_v41 = vld [vmem:[#allocation6 + $0x1c0] sm:$0xff]  }
  0x43   :  { %1010 = vmatprep.subr.bf16.mxu1 %v1120_v13  ;;  %v77_v36 = vpack.c.bf16 %v69_v33, %v69_v33  ;;  %v76_v39 = vpack.c.bf16 %v68_v38, %v68_v38  ;;  %633 = vmatprep.mubr.bf16.mxu0 %v75_v35  ;;  %v1141_v42 = vld [vmem:[#allocation6 + $0x100] sm:$0xff]   ;;  %v1143_v44 = vld [vmem:[#allocation6 + $0x148] sm:$0xff]   ;;  %v1147_v48 = vld [vmem:[#allocation6 + $0x150] sm:$0xff]  }
  0x44   :  { %v1142_v43 = vld [vmem:[#allocation6 + $0x180] sm:$0xff]   ;;  %v1144_v45 = vld [vmem:[#allocation6 + $0x1c8] sm:$0xff]   ;;  %v1148_v49 = vld [vmem:[#allocation6 + $0x1d0] sm:$0xff]  }
  0x45   :  { %989 = vmatpush3.bf16.msra.mxu0 %v1121_v14  ;;  %673 = vmatprep.mubr.bf16.mxu1 %v77_v36  ;;  %v1145_v46 = vld [vmem:[#allocation6 + $0x108] sm:$0xff]   ;;  %v1149_v50 = vld [vmem:[#allocation6 + $0x110] sm:$0xff]   ;;  %v1151_v52 = vld [vmem:[#allocation6 + $0x158] sm:$0xff]  }
  0x46   :  { %1011 = vmatpush3.bf16.msra.mxu1 %v1122_v15  ;;  %990 = vmatprep.subr.bf16.mxu0 %v1123_v16  ;;  %v1146_v47 = vld [vmem:[#allocation6 + $0x188] sm:$0xff]   ;;  %v1150_v51 = vld [vmem:[#allocation6 + $0x190] sm:$0xff]   ;;  %v1152_v53 = vld [vmem:[#allocation6 + $0x1d8] sm:$0xff]  }
  0x47   :  { %1012 = vmatprep.subr.bf16.mxu1 %v1124_v17  ;;  %v1153_v54 = vld [vmem:[#allocation6 + $0x118] sm:$0xff]   ;;  %v1155_v56 = vld [vmem:[#allocation6 + $0x160] sm:$0xff]   ;;  %v1159_v60 = vld [vmem:[#allocation6 + $0x168] sm:$0xff]   ;;  %v1282_v17 = vmov 0.0  }
  0x48   :  { %v1154_v55 = vld [vmem:[#allocation6 + $0x198] sm:$0xff]   ;;  %v1156_v57 = vld [vmem:[#allocation6 + $0x1e0] sm:$0xff]   ;;  %v1160_v61 = vld [vmem:[#allocation6 + $0x1e8] sm:$0xff]  }
  0x49   :  { %991 = vmatpush3.bf16.msra.mxu0 %v1125_v18  ;;  %v1157_v58 = vld [vmem:[#allocation6 + $0x120] sm:$0xff]   ;;  %v1161_v62 = vld [vmem:[#allocation6 + $0x128] sm:$0xff]   ;;  %v1163_v0 = vld [vmem:[#allocation6 + $0x170] sm:$0xff]  }
  0x4a   :  { %1013 = vmatpush3.bf16.msra.mxu1 %v1126_v19  ;;  %992 = vmatprep.subr.bf16.mxu0 %v1127_v20  ;;  %v1158_v59 = vld [vmem:[#allocation6 + $0x1a0] sm:$0xff]   ;;  %v1162_v63 = vld [vmem:[#allocation6 + $0x1a8] sm:$0xff]   ;;  %v1164_v1 = vld [vmem:[#allocation6 + $0x1f0] sm:$0xff]  }
  0x4b   :  { %1014 = vmatprep.subr.bf16.mxu1 %v1128_v21  ;;  %v1165_v2 = vld [vmem:[#allocation6 + $0x130] sm:$0xff]   ;;  %v1167_v4 = vld [vmem:[#allocation6 + $0x178] sm:$0xff]   ;;  %v71_v8 = vld [vmem:[#allocation3 + $0x28] sm:$0xff] }
  0x4c   :  { %v1166_v3 = vld [vmem:[#allocation6 + $0x1b0] sm:$0xff]   ;;  %v1168_v5 = vld [vmem:[#allocation6 + $0x1f8] sm:$0xff]   ;;  %v79_v10 = vpack.c.bf16 %v71_v8, %v71_v8  ;;  %v70_v12 = vld [vmem:[#allocation3 + $0x20] sm:$0xff] }
  0x4d   :  { %993 = vmatpush3.bf16.msra.mxu0 %v1129_v22  ;;  %v1169_v6 = vld [vmem:[#allocation6 + $0x138] sm:$0xff]   ;;  %v72_v13 = vld [vmem:[#allocation3 + $0x30] sm:$0xff]  ;;  %v78_v14 = vpack.c.bf16 %v70_v12, %v70_v12  ;;  %v1171_v16 = vld [vmem:[#allocation8] sm:$0xff]  }
  0x4e   :  { %1015 = vmatpush3.bf16.msra.mxu1 %v1130_v23  ;;  %994 = vmatprep.subr.bf16.mxu0 %v1131_v24  ;;  %v1170_v7 = vld [vmem:[#allocation6 + $0x1b8] sm:$0xff]   ;;  %v80_v15 = vpack.c.bf16 %v72_v13, %v72_v13  ;;  %v1172_v18 = vld [vmem:[#allocation8 + $0x8] sm:$0xff]   ;;  %v1173_v19 = vld [vmem:[#allocation8 + $0x10] sm:$0xff]  }
  0x4f   :  { %1016 = vmatprep.subr.bf16.mxu1 %v1132_v25  ;;  %v73_v9 = vld [vmem:[#allocation3 + $0x38] sm:$0xff]  ;;  %v1175_v21 = vld [vmem:[#allocation8 + $0x20] sm:$0xff]   ;;  %v1176_v22 = vld [vmem:[#allocation8 + $0x28] sm:$0xff]  }
  0x50   :  { %v81_v11 = vpack.c.bf16 %v73_v9, %v73_v9  ;;  %v1174_v20 = vld [vmem:[#allocation8 + $0x18] sm:$0xff]   ;;  %v1177_v23 = vld [vmem:[#allocation8 + $0x30] sm:$0xff]  }
  0x51   :  { %995 = vmatpush3.bf16.msra.mxu0 %v1133_v26  ;;  %v1178_v24 = vld [vmem:[#allocation8 + $0x38] sm:$0xff]  }
  0x52   :  { %1017 = vmatpush3.bf16.msra.mxu1 %v1134_v27  ;;  %996 = vmatprep.subr.bf16.mxu0 %v1135_v28  ;;  %v908_v27 = vld [vmem:[%s1377_s2] ss:$0 sm:$0xff] }
  0x53   :  { %1018 = vmatprep.subr.bf16.mxu1 %v1136_v29 }
  0x55   :  { %997 = vmatpush3.bf16.msra.mxu0 %v1137_v30 }
  0x56   :  { %1019 = vmatpush3.bf16.msra.mxu1 %v1138_v31  ;;  %1026 = vmatprep.subr.bf16.mxu0 %v1139_v40 }
  0x57   :  { %1048 = vmatprep.subr.bf16.mxu1 %v1140_v41 }
  0x58   :  { %634 = vmatmul.mubr.bf16.vlgmr.msra.gmra.mrb[0].mxu0 %v74_v37 }
  0x59   :  { %674 = vmatmul.mubr.bf16.vlgmr.msra.gmra.mrb[0].mxu1 %v76_v39  ;;  %1027 = vmatpush3.bf16.msra.mxu0 %v1141_v42 }
  0x5a   :  { %1049 = vmatpush3.bf16.msra.mxu1 %v1142_v43  ;;  %1028 = vmatprep.subr.bf16.mxu0 %v1143_v44 }
  0x5b   :  { %1050 = vmatprep.subr.bf16.mxu1 %v1144_v45  ;;  %713 = vmatprep.mubr.bf16.mxu0 %v79_v10 }
  0x5c   :  { %753 = vmatprep.mubr.bf16.mxu1 %v81_v11 }
  0x5d   :  { %1029 = vmatpush3.bf16.msra.mxu0 %v1145_v46 }
  0x5e   :  { %1051 = vmatpush3.bf16.msra.mxu1 %v1146_v47  ;;  %1030 = vmatprep.subr.bf16.mxu0 %v1147_v48 }
  0x5f   :  { %1052 = vmatprep.subr.bf16.mxu1 %v1148_v49 }
  0x61   :  { %1031 = vmatpush3.bf16.msra.mxu0 %v1149_v50 }
  0x62   :  { %1053 = vmatpush3.bf16.msra.mxu1 %v1150_v51  ;;  %1032 = vmatprep.subr.bf16.mxu0 %v1151_v52  ;;  %v981_v52 = vld [vmem:[%s1379_s4] ss:$0 sm:$0xff]  ;;  %s1249_s4 = scalar_lea.vmem %s899_s7, 128 }
  0x63   :  { %1054 = vmatprep.subr.bf16.mxu1 %v1152_v53  ;;  %p1250_p10 = scmp.ne.s32.totalorder %s899_s7, %s1249_s4  ;;  %p1255_p12 = scmp.lt.s32.totalorder %s1249_s4, %s1249_s4 }
  0x65   :  { %1033 = vmatpush3.bf16.msra.mxu0 %v1153_v54  ;;  %p1256_p13 = por %p1255_p12, %p1254_p11 }
  0x66   :  { %1055 = vmatpush3.bf16.msra.mxu1 %v1154_v55  ;;  %1034 = vmatprep.subr.bf16.mxu0 %v1155_v56 }
  0x67   :  { %1056 = vmatprep.subr.bf16.mxu1 %v1156_v57  ;;  %p1257_p0 = pnand %p1256_p13, %p1250_p10 }
  0x69   :  { %1035 = vmatpush3.bf16.msra.mxu0 %v1157_v58 }
  0x6a   :  { %1057 = vmatpush3.bf16.msra.mxu1 %v1158_v59  ;;  %1036 = vmatprep.subr.bf16.mxu0 %v1159_v60 }
  0x6b   :  { %1058 = vmatprep.subr.bf16.mxu1 %v1160_v61 }
  0x6d   :  { %1037 = vmatpush3.bf16.msra.mxu0 %v1161_v62 }
  0x6e   :  { %1059 = vmatpush3.bf16.msra.mxu1 %v1162_v63  ;;  %1038 = vmatprep.subr.bf16.mxu0 %v1163_v0 }
  0x6f   :  { %1060 = vmatprep.subr.bf16.mxu1 %v1164_v1 }
  0x71   :  { %1039 = vmatpush3.bf16.msra.mxu0 %v1165_v2 }
  0x72   :  { %1061 = vmatpush3.bf16.msra.mxu1 %v1166_v3  ;;  %1040 = vmatprep.subr.bf16.mxu0 %v1167_v4 }
  0x73   :  { %1062 = vmatprep.subr.bf16.mxu1 %v1168_v5 }
  0x75   :  { %1041 = vmatpush3.bf16.msra.mxu0 %v1169_v6 }
  0x76   :  { %1063 = vmatpush3.bf16.msra.mxu1 %v1170_v7  ;;  %1079 = vmatprep.subr.bf16.mxu0 %v1282_v17 }
  0x78   :  { %714 = vmatmul.mubr.bf16.vlgmr.msra.gmra.mrb[4].mxu0 %v78_v14 }
  0x79   :  { %754 = vmatmul.mubr.bf16.vlgmr.msra.gmra.mrb[4].mxu1 %v80_v15  ;;  %1080 = vmatpush3.bf16.msra.mxu0 %v1171_v16 }
  0x7a   :  { %1081 = vmatprep.subr.bf16.mxu0 %v1282_v17  ;;  %1095 = vmatprep.mubr.msk.bf16.mxu0 %vm1283_vm0, %v1282_v17 }
  0x7d   :  { %1082 = vmatpush3.bf16.msra.mxu0 %v1172_v18 }
  0x7e   :  { %1083 = vmatprep.subr.bf16.mxu0 %v1282_v17 }
  0x81   :  { %1084 = vmatpush3.bf16.msra.mxu0 %v1173_v19 }
  0x82   :  { %1085 = vmatprep.subr.bf16.mxu0 %v1282_v17 }
  0x85   :  { %1086 = vmatpush3.bf16.msra.mxu0 %v1174_v20 }
  0x86   :  { %1087 = vmatprep.subr.bf16.mxu0 %v1282_v17 }
  0x89   :  { %1088 = vmatpush3.bf16.msra.mxu0 %v1175_v21 }
  0x8a   :  { %1089 = vmatprep.subr.bf16.mxu0 %v1282_v17 }
  0x8d   :  { %1090 = vmatpush3.bf16.msra.mxu0 %v1176_v22 }
  0x8e   :  { %1091 = vmatprep.subr.bf16.mxu0 %v1282_v17 }
  0x91   :  { %1092 = vmatpush3.bf16.msra.mxu0 %v1177_v23 }
  0x92   :  { %1093 = vmatprep.subr.bf16.mxu0 %v1282_v17 }
  0x95   :  { %1094 = vmatpush3.bf16.msra.mxu0 %v1178_v24 }
 0x12b   :  { %v998_v25 = vpop.f32.mrb[0].mxu0 }
 0x12c   :  { %v1020_v26 = vpop.f32.mrb[0].mxu1  ;;  %v999_v28 = vpop.f32.mrb[1].mxu0 }
 0x12d   :  { %v1021_v29 = vpop.f32.mrb[1].mxu1  ;;  %v1000_v30 = vadd.f32 %v999_v28, %v998_v25  ;;  %v1001_v32 = vpop.f32.mrb[2].mxu0 }
 0x12e   :  { %v1022_v31 = vadd.f32 %v1021_v29, %v1020_v26  ;;  %v1023_v33 = vpop.f32.mrb[2].mxu1  ;;  %v1002_v34 = vpop.f32.mrb[3].mxu0 }
 0x12f   :  { %v1024_v35 = vpop.f32.mrb[3].mxu1  ;;  %v636_v36 = vadd.f32 %v1000_v30, %v908_v27 }
 0x131   :  { %v676_v37 = vadd.f32 %v1022_v31, %v636_v36 }
 0x14b   :  { %v1042_v38 = vpop.f32.mrb[4].mxu0 }
 0x14c   :  { %v1064_v39 = vpop.f32.mrb[4].mxu1  ;;  %v1043_v40 = vpop.f32.mrb[5].mxu0 }
 0x14d   :  { %v1044_v41 = vadd.f32 %v1043_v40, %v1042_v38  ;;  %v1065_v42 = vpop.f32.mrb[5].mxu1  ;;  %v1045_v43 = vpop.f32.mrb[6].mxu0 }
 0x14e   :  { %v1066_v44 = vadd.f32 %v1065_v42, %v1064_v39  ;;  %v1067_v45 = vpop.f32.mrb[6].mxu1  ;;  %v1046_v46 = vpop.f32.mrb[7].mxu0 }
 0x14f   :  { %v716_v47 = vadd.f32 %v1044_v41, %v676_v37  ;;  %v1068_v48 = vpop.f32.mrb[7].mxu1 }
 0x151   :  { %v756_v49 = vadd.f32 %v1066_v44, %v716_v47 }
 0x153   :  { %v761_v50 = vmax.f32 %v756_v49, 0.0 }
 0x155   :  { %v763_v51 = vpack.c.bf16 %v761_v50, %v761_v50 }
 0x157   :  { %1096 = vmatmul.mubr.bf16.vlgmr.msra.gmra.mrb[8].mxu0 %v763_v51 }
 0x22a   :  { %v862_v53 = vpop.f32.mrb[8].mxu0 }
 0x22b   :  { %v881_v54 = vadd.f32 %v981_v52, %v862_v53  ;;  %v1097_v55 = vpop.f32.mrb[9].mxu0 }
 0x22c   :  { %v865_v56 = vpop.f32.mrb[10].mxu0 }
 0x22d   :  { %882 = vmax.xlane.f32.xlu0 %v881_v54  ;;  %v1098_v57 = vpop.f32.mrb[11].mxu0 }
 0x2ba   :  { %v883_v58 = vpop.xlane.xlu0 %882 }
 0x2bb   :  { %v884_v59 = vsub.f32 %v881_v54, %v883_v58 }
 0x2bd   :  { %v885_v60 = vmul.f32 1.442695, %v884_v59 }
 0x2bf   :  { %1179 = vpow2.f32 %v885_v60 }
 0x2c9   :  { %v1180_v61 = vpop.eup %1179 }
 0x2ca   :  { %887 = vadd.xlane.f32.xlu0 %v1180_v61 }
 0x357   :  { %v888_v62 = vpop.xlane.xlu0 %887 }
 0x358   :  { %1181 = vrcp.f32 %v888_v62 }
 0x362   :  { %v1182_v63 = vpop.eup %1181 }
 0x363   :  { %v890_v0 = vmul.f32 %v1182_v63, %v1180_v61 }
 0x365   :  { %891 = vst [vmem:[#allocation9] sm:$0xff] %v890_v0 }
 0x366   :  { %1260 = shalt.err (!%p1257_p0)
}
 0x367   :  { %s1261_s10 = scalar_lea.hbm %s1380_s5, 128 }
 0x368   :  { %p1262_p1 = scmp.ne.s32.totalorder %s1380_s5, %s1261_s10  ;;  %p1265_p2 = scmp.lt.u32.totalorder %s1261_s10, %s1380_s5 }
 0x36a   :  { %p1267_p3 = pnand %p1265_p2, %p1262_p1 }
 0x36c   :  { %1270 = shalt.err (!%p1267_p3)
}
 0x36d   :  { %901 = dma.vmem_to_hbm [thread:$0]  %s899_s7, 128, %s1380_s5, [#allocation5]  }
 0x36e   :  { %1275 = dma.done.wait [#allocation5], 128  }
 0x36f   :  { %1276 = vsyncadd [#allocation5], 4294967168 }
 0x370   :  { %905 = vsyncpa [#allocation4], 1 }
 0x371   :  { %906 = vsyncpa [#allocation7], 1 }
 0x372   :  { %907 = vsyncpa [#allocation5], 1 }

// kernel: tpu_custom_call.1
= control target key start
LH: loop header
LB: loop body
LE: loop exit
PB: predicated region body
PF: predicated region fallthrough
CT: control target
= control target key end

     0   :  { %10 = vsyncpa [#allocation4], 0  ;;  %s1375_s0 = inlined_call_operand.hbm [shape: f32[8,1024], index: 0, kind: input, shape index: {}]   ;;  %s1376_s1 = inlined_call_operand.hbm [shape: bf16[1024,128], index: 1, kind: input, shape index: {}]   ;;  %s1377_s2 = inlined_call_operand.vmem [shape: f32[1,128], index: 2, kind: input, shape index: {}]   ;;  %s1378_s3 = inlined_call_operand.hbm [shape: bf16[128,128], index: 3, kind: input, shape index: {}]   ;;  %s1379_s4 = inlined_call_operand.vmem [shape: f32[1,128], index: 4, kind: input, shape index: {}]   ;;  %s1380_s5 = inlined_call_operand.hbm [shape: f32[8,128], index: 5, kind: output, shape index: {}]  }
   0x1   :  { %11 = vsyncpa [#allocation7], 0 }
   0x2   :  { %12 = vsyncpa [#allocation5], 0  ;;  %s1277_s18 = smov [#allocation6]   ;;  %s1183_s22 = scalar_lea.hbm %s1376_s1, 8192 }
   0x3   :  { %s28_s19 = sshll.u32 %s1277_s18, 4  ;;  %p1184_p0 = scmp.ne.s32.totalorder %s1376_s1, %s1183_s22  ;;  %s29_s19 = int_to_ptr.vmem [resolvable:$true] %s28_s19 }
   0x4   :  { %p1187_p1 = scmp.lt.u32.totalorder %s1183_s22, %s1376_s1 }
   0x6   :  { %p1189_p2 = pnand %p1187_p1, %p1184_p0 }
   0x8   :  { %1192 = shalt.err (!%p1189_p2)
}
   0x9   :  { %s1193_s27 = scalar_lea.vmem %s29_s19, 8192  ;;  %p1198_p4 = scmp.lt.s32.totalorder %s29_s19, %s29_s19 }
   0xa   :  { %p1194_p3 = scmp.ne.s32.totalorder %s29_s19, %s1193_s27  ;;  %p1199_p5 = scmp.lt.s32.totalorder %s1193_s27, %s1193_s27 }
   0xc   :  { %p1200_p6 = por %p1199_p5, %p1198_p4 }
   0xe   :  { %p1201_p7 = pnand %p1200_p6, %p1194_p3 }
  0x10   :  { %1204 = shalt.err (!%p1201_p7)
}
  0x11   :  { %s1278_s28 = smov 64   ;;  %s1279_s29 = smov 4  }
  0x12   :  { %34 = dma.hbm_to_vmem [thread:$0]  %s1376_s1, 8192, %s29_s19, [#allocation7], %s1278_s28, %s1278_s28, %s1279_s29  }
  0x13   :  { %s1280_s7 = smov [#allocation3]   ;;  %s1281_s9 = smov [#allocation8]  }
  0x14   :  { %s19_s8 = sshll.u32 %s1280_s7, 4  ;;  %s42_s10 = sshll.u32 %s1281_s9, 4  ;;  %s20_s8 = int_to_ptr.vmem [resolvable:$true] %s19_s8  ;;  %s43_s10 = int_to_ptr.vmem [resolvable:$true] %s42_s10 }
  0x15   :  { %s1205_s13 = scalar_lea.hbm %s1375_s0, 1024 }
  0x16   :  { %p1206_p8 = scmp.ne.s32.totalorder %s1375_s0, %s1205_s13  ;;  %p1209_p9 = scmp.lt.u32.totalorder %s1205_s13, %s1375_s0 }
  0x18   :  { %p1211_p10 = pnand %p1209_p9, %p1206_p8 }
  0x1a   :  { %1214 = shalt.err (!%p1211_p10)
}
  0x1b   :  { %s1215_s1 = scalar_lea.vmem %s20_s8, 1024  ;;  %p1220_p12 = scmp.lt.s32.totalorder %s20_s8, %s20_s8 }
  0x1c   :  { %p1216_p11 = scmp.ne.s32.totalorder %s20_s8, %s1215_s1  ;;  %p1221_p13 = scmp.lt.s32.totalorder %s1215_s1, %s1215_s1 }
  0x1e   :  { %p1222_p0 = por %p1221_p13, %p1220_p12 }
  0x20   :  { %p1223_p1 = pnand %p1222_p0, %p1216_p11 }
  0x22   :  { %1226 = shalt.err (!%p1223_p1)
}
  0x23   :  { %22 = dma.hbm_to_vmem [thread:$0]  %s1375_s0, 1024, %s20_s8, [#allocation4]  }
  0x24   :  { %s1227_s22 = scalar_lea.hbm %s1378_s3, 1024 }
  0x25   :  { %p1228_p2 = scmp.ne.s32.totalorder %s1378_s3, %s1227_s22  ;;  %p1231_p3 = scmp.lt.u32.totalorder %s1227_s22, %s1378_s3 }
  0x27   :  { %p1233_p4 = pnand %p1231_p3, %p1228_p2 }
  0x29   :  { %1236 = shalt.err (!%p1233_p4)
}
  0x2a   :  { %s1237_s27 = scalar_lea.vmem %s43_s10, 1024  ;;  %p1242_p6 = scmp.lt.s32.totalorder %s43_s10, %s43_s10 }
  0x2b   :  { %p1238_p5 = scmp.ne.s32.totalorder %s43_s10, %s1237_s27  ;;  %p1243_p7 = scmp.lt.s32.totalorder %s1237_s27, %s1237_s27 }
  0x2d   :  { %p1244_p8 = por %p1243_p7, %p1242_p6 }
  0x2f   :  { %p1245_p9 = pnand %p1244_p8, %p1238_p5 }
  0x31   :  { %1248 = shalt.err (!%p1245_p9)
}
  0x32   :  { %48 = dma.hbm_to_vmem [thread:$0]  %s1378_s3, 1024, %s43_s10, [#allocation7], %s1278_s28, %s1278_s28, %s1279_s29  }
  0x33   :  { %1271 = dma.done.wait [#allocation4], 1024  }
  0x34   :  { %1272 = vsyncadd [#allocation4], 4294966272 }
  0x35   :  { %1273 = dma.done.wait [#allocation7], 9216  }
  0x36   :  { %1274 = vsyncadd [#allocation7], 4294958080  ;;  %v1107_v0 = vld [vmem:[#allocation6 + $0x40] sm:$0xff]   ;;  %v1111_v4 = vld [vmem:[#allocation6 + $0x48] sm:$0xff]   ;;  %vm1283_vm0 = vmmov 0   ;;  %s1284_s6 = smov [#allocation9]  }
  0x37   :  { %v1108_v1 = vld [vmem:[#allocation6 + $0xc0] sm:$0xff]   ;;  %982 = vmatprep.subr.bf16.mxu0 %v1107_v0  ;;  %v1112_v5 = vld [vmem:[#allocation6 + $0xc8] sm:$0xff]   ;;  %v1115_v8 = vld [vmem:[#allocation6 + $0x50] sm:$0xff]   ;;  %s898_s7 = sshll.u32 %s1284_s6, 4  ;;  %s899_s7 = int_to_ptr.vmem [resolvable:$true] %s898_s7 }
  0x38   :  { %v1109_v2 = vld [vmem:[#allocation6] sm:$0xff]   ;;  %1004 = vmatprep.subr.bf16.mxu1 %v1108_v1  ;;  %v1113_v6 = vld [vmem:[#allocation6 + $0x8] sm:$0xff]   ;;  %v1116_v9 = vld [vmem:[#allocation6 + $0xd0] sm:$0xff]   ;;  %p1254_p11 = scmp.lt.s32.totalorder %s899_s7, %s899_s7 }
  0x39   :  { %v1110_v3 = vld [vmem:[#allocation6 + $0x80] sm:$0xff]   ;;  %983 = vmatpush3.bf16.msra.mxu0 %v1109_v2  ;;  %v1114_v7 = vld [vmem:[#allocation6 + $0x88] sm:$0xff]   ;;  %v1117_v10 = vld [vmem:[#allocation6 + $0x10] sm:$0xff]  }
  0x3a   :  { %1005 = vmatpush3.bf16.msra.mxu1 %v1110_v3  ;;  %984 = vmatprep.subr.bf16.mxu0 %v1111_v4  ;;  %v1118_v11 = vld [vmem:[#allocation6 + $0x90] sm:$0xff]   ;;  %v1119_v12 = vld [vmem:[#allocation6 + $0x58] sm:$0xff]   ;;  %v1123_v16 = vld [vmem:[#allocation6 + $0x60] sm:$0xff]  }
  0x3b   :  { %1006 = vmatprep.subr.bf16.mxu1 %v1112_v5  ;;  %v1120_v13 = vld [vmem:[#allocation6 + $0xd8] sm:$0xff]   ;;  %v1124_v17 = vld [vmem:[#allocation6 + $0xe0] sm:$0xff]   ;;  %v1127_v20 = vld [vmem:[#allocation6 + $0x68] sm:$0xff]  }
  0x3c   :  { %v1121_v14 = vld [vmem:[#allocation6 + $0x18] sm:$0xff]   ;;  %v1125_v18 = vld [vmem:[#allocation6 + $0x20] sm:$0xff]   ;;  %v1128_v21 = vld [vmem:[#allocation6 + $0xe8] sm:$0xff]  }
  0x3d   :  { %985 = vmatpush3.bf16.msra.mxu0 %v1113_v6  ;;  %v1122_v15 = vld [vmem:[#allocation6 + $0x98] sm:$0xff]   ;;  %v1126_v19 = vld [vmem:[#allocation6 + $0xa0] sm:$0xff]   ;;  %v1129_v22 = vld [vmem:[#allocation6 + $0x28] sm:$0xff]  }
  0x3e   :  { %1007 = vmatpush3.bf16.msra.mxu1 %v1114_v7  ;;  %986 = vmatprep.subr.bf16.mxu0 %v1115_v8  ;;  %v1130_v23 = vld [vmem:[#allocation6 + $0xa8] sm:$0xff]   ;;  %v1131_v24 = vld [vmem:[#allocation6 + $0x70] sm:$0xff]   ;;  %v1135_v28 = vld [vmem:[#allocation6 + $0x78] sm:$0xff]  }
  0x3f   :  { %1008 = vmatprep.subr.bf16.mxu1 %v1116_v9  ;;  %v1132_v25 = vld [vmem:[#allocation6 + $0xf0] sm:$0xff]   ;;  %v1136_v29 = vld [vmem:[#allocation6 + $0xf8] sm:$0xff]   ;;  %v67_v32 = vld [vmem:[#allocation3 + $0x8] sm:$0xff] }
  0x40   :  { %v1133_v26 = vld [vmem:[#allocation6 + $0x30] sm:$0xff]   ;;  %v1137_v30 = vld [vmem:[#allocation6 + $0x38] sm:$0xff]   ;;  %v66_v34 = vld [vmem:[#allocation3] sm:$0xff]  ;;  %v75_v35 = vpack.c.bf16 %v67_v32, %v67_v32 }
  0x41   :  { %987 = vmatpush3.bf16.msra.mxu0 %v1117_v10  ;;  %v1134_v27 = vld [vmem:[#allocation6 + $0xb0] sm:$0xff]   ;;  %v1138_v31 = vld [vmem:[#allocation6 + $0xb8] sm:$0xff]   ;;  %v74_v37 = vpack.c.bf16 %v66_v34, %v66_v34  ;;  %v1139_v40 = vld [vmem:[#allocation6 + $0x140] sm:$0xff]  }
  0x42   :  { %1009 = vmatpush3.bf16.msra.mxu1 %v1118_v11  ;;  %988 = vmatprep.subr.bf16.mxu0 %v1119_v12  ;;  %v69_v33 = vld [vmem:[#allocation3 + $0x18] sm:$0xff]  ;;  %v68_v38 = vld [vmem:[#allocation3 + $0x10] sm:$0xff]  ;;  %v1140_v41 = vld [vmem:[#allocation6 + $0x1c0] sm:$0xff]  }
  0x43   :  { %1010 = vmatprep.subr.bf16.mxu1 %v1120_v13  ;;  %v77_v36 = vpack.c.bf16 %v69_v33, %v69_v33  ;;  %v76_v39 = vpack.c.bf16 %v68_v38, %v68_v38  ;;  %633 = vmatprep.mubr.bf16.mxu0 %v75_v35  ;;  %v1141_v42 = vld [vmem:[#allocation6 + $0x100] sm:$0xff]   ;;  %v1143_v44 = vld [vmem:[#allocation6 + $0x148] sm:$0xff]   ;;  %v1147_v48 = vld [vmem:[#allocation6 + $0x150] sm:$0xff]  }
  0x44   :  { %v1142_v43 = vld [vmem:[#allocation6 + $0x180] sm:$0xff]   ;;  %v1144_v45 = vld [vmem:[#allocation6 + $0x1c8] sm:$0xff]   ;;  %v1148_v49 = vld [vmem:[#allocation6 + $0x1d0] sm:$0xff]  }
  0x45   :  { %989 = vmatpush3.bf16.msra.mxu0 %v1121_v14  ;;  %673 = vmatprep.mubr.bf16.mxu1 %v77_v36  ;;  %v1145_v46 = vld [vmem:[#allocation6 + $0x108] sm:$0xff]   ;;  %v1149_v50 = vld [vmem:[#allocation6 + $0x110] sm:$0xff]   ;;  %v1151_v52 = vld [vmem:[#allocation6 + $0x158] sm:$0xff]  }
  0x46   :  { %1011 = vmatpush3.bf16.msra.mxu1 %v1122_v15  ;;  %990 = vmatprep.subr.bf16.mxu0 %v1123_v16  ;;  %v1146_v47 = vld [vmem:[#allocation6 + $0x188] sm:$0xff]   ;;  %v1150_v51 = vld [vmem:[#allocation6 + $0x190] sm:$0xff]   ;;  %v1152_v53 = vld [vmem:[#allocation6 + $0x1d8] sm:$0xff]  }
  0x47   :  { %1012 = vmatprep.subr.bf16.mxu1 %v1124_v17  ;;  %v1153_v54 = vld [vmem:[#allocation6 + $0x118] sm:$0xff]   ;;  %v1155_v56 = vld [vmem:[#allocation6 + $0x160] sm:$0xff]   ;;  %v1159_v60 = vld [vmem:[#allocation6 + $0x168] sm:$0xff]   ;;  %v1282_v17 = vmov 0.0  }
  0x48   :  { %v1154_v55 = vld [vmem:[#allocation6 + $0x198] sm:$0xff]   ;;  %v1156_v57 = vld [vmem:[#allocation6 + $0x1e0] sm:$0xff]   ;;  %v1160_v61 = vld [vmem:[#allocation6 + $0x1e8] sm:$0xff]  }
  0x49   :  { %991 = vmatpush3.bf16.msra.mxu0 %v1125_v18  ;;  %v1157_v58 = vld [vmem:[#allocation6 + $0x120] sm:$0xff]   ;;  %v1161_v62 = vld [vmem:[#allocation6 + $0x128] sm:$0xff]   ;;  %v1163_v0 = vld [vmem:[#allocation6 + $0x170] sm:$0xff]  }
  0x4a   :  { %1013 = vmatpush3.bf16.msra.mxu1 %v1126_v19  ;;  %992 = vmatprep.subr.bf16.mxu0 %v1127_v20  ;;  %v1158_v59 = vld [vmem:[#allocation6 + $0x1a0] sm:$0xff]   ;;  %v1162_v63 = vld [vmem:[#allocation6 + $0x1a8] sm:$0xff]   ;;  %v1164_v1 = vld [vmem:[#allocation6 + $0x1f0] sm:$0xff]  }
  0x4b   :  { %1014 = vmatprep.subr.bf16.mxu1 %v1128_v21  ;;  %v1165_v2 = vld [vmem:[#allocation6 + $0x130] sm:$0xff]   ;;  %v1167_v4 = vld [vmem:[#allocation6 + $0x178] sm:$0xff]   ;;  %v71_v8 = vld [vmem:[#allocation3 + $0x28] sm:$0xff] }
  0x4c   :  { %v1166_v3 = vld [vmem:[#allocation6 + $0x1b0] sm:$0xff]   ;;  %v1168_v5 = vld [vmem:[#allocation6 + $0x1f8] sm:$0xff]   ;;  %v79_v10 = vpack.c.bf16 %v71_v8, %v71_v8  ;;  %v70_v12 = vld [vmem:[#allocation3 + $0x20] sm:$0xff] }
  0x4d   :  { %993 = vmatpush3.bf16.msra.mxu0 %v1129_v22  ;;  %v1169_v6 = vld [vmem:[#allocation6 + $0x138] sm:$0xff]   ;;  %v72_v13 = vld [vmem:[#allocation3 + $0x30] sm:$0xff]  ;;  %v78_v14 = vpack.c.bf16 %v70_v12, %v70_v12  ;;  %v1171_v16 = vld [vmem:[#allocation8] sm:$0xff]  }
  0x4e   :  { %1015 = vmatpush3.bf16.msra.mxu1 %v1130_v23  ;;  %994 = vmatprep.subr.bf16.mxu0 %v1131_v24  ;;  %v1170_v7 = vld [vmem:[#allocation6 + $0x1b8] sm:$0xff]   ;;  %v80_v15 = vpack.c.bf16 %v72_v13, %v72_v13  ;;  %v1172_v18 = vld [vmem:[#allocation8 + $0x8] sm:$0xff]   ;;  %v1173_v19 = vld [vmem:[#allocation8 + $0x10] sm:$0xff]  }
  0x4f   :  { %1016 = vmatprep.subr.bf16.mxu1 %v1132_v25  ;;  %v73_v9 = vld [vmem:[#allocation3 + $0x38] sm:$0xff]  ;;  %v1175_v21 = vld [vmem:[#allocation8 + $0x20] sm:$0xff]   ;;  %v1176_v22 = vld [vmem:[#allocation8 + $0x28] sm:$0xff]  }
  0x50   :  { %v81_v11 = vpack.c.bf16 %v73_v9, %v73_v9  ;;  %v1174_v20 = vld [vmem:[#allocation8 + $0x18] sm:$0xff]   ;;  %v1177_v23 = vld [vmem:[#allocation8 + $0x30] sm:$0xff]  }
  0x51   :  { %995 = vmatpush3.bf16.msra.mxu0 %v1133_v26  ;;  %v1178_v24 = vld [vmem:[#allocation8 + $0x38] sm:$0xff]  }
  0x52   :  { %1017 = vmatpush3.bf16.msra.mxu1 %v1134_v27  ;;  %996 = vmatprep.subr.bf16.mxu0 %v1135_v28  ;;  %v908_v27 = vld [vmem:[%s1377_s2] ss:$0 sm:$0xff] }
  0x53   :  { %1018 = vmatprep.subr.bf16.mxu1 %v1136_v29 }
  0x55   :  { %997 = vmatpush3.bf16.msra.mxu0 %v1137_v30 }
  0x56   :  { %1019 = vmatpush3.bf16.msra.mxu1 %v1138_v31  ;;  %1026 = vmatprep.subr.bf16.mxu0 %v1139_v40 }
  0x57   :  { %1048 = vmatprep.subr.bf16.mxu1 %v1140_v41 }
  0x58   :  { %634 = vmatmul.mubr.bf16.vlgmr.msra.gmra.mrb[0].mxu0 %v74_v37 }
  0x59   :  { %674 = vmatmul.mubr.bf16.vlgmr.msra.gmra.mrb[0].mxu1 %v76_v39  ;;  %1027 = vmatpush3.bf16.msra.mxu0 %v1141_v42 }
  0x5a   :  { %1049 = vmatpush3.bf16.msra.mxu1 %v1142_v43  ;;  %1028 = vmatprep.subr.bf16.mxu0 %v1143_v44 }
  0x5b   :  { %1050 = vmatprep.subr.bf16.mxu1 %v1144_v45  ;;  %713 = vmatprep.mubr.bf16.mxu0 %v79_v10 }
  0x5c   :  { %753 = vmatprep.mubr.bf16.mxu1 %v81_v11 }
  0x5d   :  { %1029 = vmatpush3.bf16.msra.mxu0 %v1145_v46 }
  0x5e   :  { %1051 = vmatpush3.bf16.msra.mxu1 %v1146_v47  ;;  %1030 = vmatprep.subr.bf16.mxu0 %v1147_v48 }
  0x5f   :  { %1052 = vmatprep.subr.bf16.mxu1 %v1148_v49 }
  0x61   :  { %1031 = vmatpush3.bf16.msra.mxu0 %v1149_v50 }
  0x62   :  { %1053 = vmatpush3.bf16.msra.mxu1 %v1150_v51  ;;  %1032 = vmatprep.subr.bf16.mxu0 %v1151_v52  ;;  %v981_v52 = vld [vmem:[%s1379_s4] ss:$0 sm:$0xff]  ;;  %s1249_s4 = scalar_lea.vmem %s899_s7, 128 }
  0x63   :  { %1054 = vmatprep.subr.bf16.mxu1 %v1152_v53  ;;  %p1250_p10 = scmp.ne.s32.totalorder %s899_s7, %s1249_s4  ;;  %p1255_p12 = scmp.lt.s32.totalorder %s1249_s4, %s1249_s4 }
  0x65   :  { %1033 = vmatpush3.bf16.msra.mxu0 %v1153_v54  ;;  %p1256_p13 = por %p1255_p12, %p1254_p11 }
  0x66   :  { %1055 = vmatpush3.bf16.msra.mxu1 %v1154_v55  ;;  %1034 = vmatprep.subr.bf16.mxu0 %v1155_v56 }
  0x67   :  { %1056 = vmatprep.subr.bf16.mxu1 %v1156_v57  ;;  %p1257_p0 = pnand %p1256_p13, %p1250_p10 }
  0x69   :  { %1035 = vmatpush3.bf16.msra.mxu0 %v1157_v58 }
  0x6a   :  { %1057 = vmatpush3.bf16.msra.mxu1 %v1158_v59  ;;  %1036 = vmatprep.subr.bf16.mxu0 %v1159_v60 }
  0x6b   :  { %1058 = vmatprep.subr.bf16.mxu1 %v1160_v61 }
  0x6d   :  { %1037 = vmatpush3.bf16.msra.mxu0 %v1161_v62 }
  0x6e   :  { %1059 = vmatpush3.bf16.msra.mxu1 %v1162_v63  ;;  %1038 = vmatprep.subr.bf16.mxu0 %v1163_v0 }
  0x6f   :  { %1060 = vmatprep.subr.bf16.mxu1 %v1164_v1 }
  0x71   :  { %1039 = vmatpush3.bf16.msra.mxu0 %v1165_v2 }
  0x72   :  { %1061 = vmatpush3.bf16.msra.mxu1 %v1166_v3  ;;  %1040 = vmatprep.subr.bf16.mxu0 %v1167_v4 }
  0x73   :  { %1062 = vmatprep.subr.bf16.mxu1 %v1168_v5 }
  0x75   :  { %1041 = vmatpush3.bf16.msra.mxu0 %v1169_v6 }
  0x76   :  { %1063 = vmatpush3.bf16.msra.mxu1 %v1170_v7  ;;  %1079 = vmatprep.subr.bf16.mxu0 %v1282_v17 }
  0x78   :  { %714 = vmatmul.mubr.bf16.vlgmr.msra.gmra.mrb[4].mxu0 %v78_v14 }
  0x79   :  { %754 = vmatmul.mubr.bf16.vlgmr.msra.gmra.mrb[4].mxu1 %v80_v15  ;;  %1080 = vmatpush3.bf16.msra.mxu0 %v1171_v16 }
  0x7a   :  { %1081 = vmatprep.subr.bf16.mxu0 %v1282_v17  ;;  %1095 = vmatprep.mubr.msk.bf16.mxu0 %vm1283_vm0, %v1282_v17 }
  0x7d   :  { %1082 = vmatpush3.bf16.msra.mxu0 %v1172_v18 }
  0x7e   :  { %1083 = vmatprep.subr.bf16.mxu0 %v1282_v17 }
  0x81   :  { %1084 = vmatpush3.bf16.msra.mxu0 %v1173_v19 }
  0x82   :  { %1085 = vmatprep.subr.bf16.mxu0 %v1282_v17 }
  0x85   :  { %1086 = vmatpush3.bf16.msra.mxu0 %v1174_v20 }
  0x86   :  { %1087 = vmatprep.subr.bf16.mxu0 %v1282_v17 }
  0x89   :  { %1088 = vmatpush3.bf16.msra.mxu0 %v1175_v21 }
  0x8a   :  { %1089 = vmatprep.subr.bf16.mxu0 %v1282_v17 }
  0x8d   :  { %1090 = vmatpush3.bf16.msra.mxu0 %v1176_v22 }
  0x8e   :  { %1091 = vmatprep.subr.bf16.mxu0 %v1282_v17 }
  0x91   :  { %1092 = vmatpush3.bf16.msra.mxu0 %v1177_v23 }
  0x92   :  { %1093 = vmatprep.subr.bf16.mxu0 %v1282_v17 }
  0x95   :  { %1094 = vmatpush3.bf16.msra.mxu0 %v1178_v24 }
 0x12b   :  { %v998_v25 = vpop.f32.mrb[0].mxu0 }
 0x12c   :  { %v1020_v26 = vpop.f32.mrb[0].mxu1  ;;  %v999_v28 = vpop.f32.mrb[1].mxu0 }
 0x12d   :  { %v1021_v29 = vpop.f32.mrb[1].mxu1  ;;  %v1000_v30 = vadd.f32 %v999_v28, %v998_v25  ;;  %v1001_v32 = vpop.f32.mrb[2].mxu0 }
 0x12e   :  { %v1022_v31 = vadd.f32 %v1021_v29, %v1020_v26  ;;  %v1023_v33 = vpop.f32.mrb[2].mxu1  ;;  %v1002_v34 = vpop.f32.mrb[3].mxu0 }
 0x12f   :  { %v1024_v35 = vpop.f32.mrb[3].mxu1  ;;  %v636_v36 = vadd.f32 %v1000_v30, %v908_v27 }
 0x131   :  { %v676_v37 = vadd.f32 %v1022_v31, %v636_v36 }
 0x14b   :  { %v1042_v38 = vpop.f32.mrb[4].mxu0 }
 0x14c   :  { %v1064_v39 = vpop.f32.mrb[4].mxu1  ;;  %v1043_v40 = vpop.f32.mrb[5].mxu0 }
 0x14d   :  { %v1044_v41 = vadd.f32 %v1043_v40, %v1042_v38  ;;  %v1065_v42 = vpop.f32.mrb[5].mxu1  ;;  %v1045_v43 = vpop.f32.mrb[6].mxu0 }
 0x14e   :  { %v1066_v44 = vadd.f32 %v1065_v42, %v1064_v39  ;;  %v1067_v45 = vpop.f32.mrb[6].mxu1  ;;  %v1046_v46 = vpop.f32.mrb[7].mxu0 }
 0x14f   :  { %v716_v47 = vadd.f32 %v1044_v41, %v676_v37  ;;  %v1068_v48 = vpop.f32.mrb[7].mxu1 }
 0x151   :  { %v756_v49 = vadd.f32 %v1066_v44, %v716_v47 }
 0x153   :  { %v761_v50 = vmax.f32 %v756_v49, 0.0 }
 0x155   :  { %v763_v51 = vpack.c.bf16 %v761_v50, %v761_v50 }
 0x157   :  { %1096 = vmatmul.mubr.bf16.vlgmr.msra.gmra.mrb[8].mxu0 %v763_v51 }
 0x22a   :  { %v862_v53 = vpop.f32.mrb[8].mxu0 }
 0x22b   :  { %v881_v54 = vadd.f32 %v981_v52, %v862_v53  ;;  %v1097_v55 = vpop.f32.mrb[9].mxu0 }
 0x22c   :  { %v865_v56 = vpop.f32.mrb[10].mxu0 }
 0x22d   :  { %882 = vmax.xlane.f32.xlu0 %v881_v54  ;;  %v1098_v57 = vpop.f32.mrb[11].mxu0 }
 0x2ba   :  { %v883_v58 = vpop.xlane.xlu0 %882 }
 0x2bb   :  { %v884_v59 = vsub.f32 %v881_v54, %v883_v58 }
 0x2bd   :  { %v885_v60 = vmul.f32 1.442695, %v884_v59 }
 0x2bf   :  { %1179 = vpow2.f32 %v885_v60 }
 0x2c9   :  { %v1180_v61 = vpop.eup %1179 }
 0x2ca   :  { %887 = vadd.xlane.f32.xlu0 %v1180_v61 }
 0x357   :  { %v888_v62 = vpop.xlane.xlu0 %887 }
 0x358   :  { %1181 = vrcp.f32 %v888_v62 }
 0x362   :  { %v1182_v63 = vpop.eup %1181 }
 0x363   :  { %v890_v0 = vmul.f32 %v1182_v63, %v1180_v61 }
 0x365   :  { %891 = vst [vmem:[#allocation9] sm:$0xff] %v890_v0 }
 0x366   :  { %1260 = shalt.err (!%p1257_p0)
}
 0x367   :  { %s1261_s10 = scalar_lea.hbm %s1380_s5, 128 }
 0x368   :  { %p1262_p1 = scmp.ne.s32.totalorder %s1380_s5, %s1261_s10  ;;  %p1265_p2 = scmp.lt.u32.totalorder %s1261_s10, %s1380_s5 }
 0x36a   :  { %p1267_p3 = pnand %p1265_p2, %p1262_p1 }
 0x36c   :  { %1270 = shalt.err (!%p1267_p3)
}
 0x36d   :  { %901 = dma.vmem_to_hbm [thread:$0]  %s899_s7, 128, %s1380_s5, [#allocation5]  }
 0x36e   :  { %1275 = dma.done.wait [#allocation5], 128  }
 0x36f   :  { %1276 = vsyncadd [#allocation5], 4294967168 }
 0x370   :  { %905 = vsyncpa [#allocation4], 1 }
 0x371   :  { %906 = vsyncpa [#allocation7], 1 }
 0x372   :  { %907 = vsyncpa [#allocation5], 1 }

</bundles_post_ra>
